<compile_context>
chip_gen: v7x
topology: tpu7x:2x2x1
jax: 0.10.0
libtpu: 0.0.40
codegen_flags: <defaults>
</compile_context>

<pallas_src>
import functools

import jax
import jax.numpy as jnp
from jax.experimental import pallas as pl
from jax.experimental.pallas import tpu as pltpu


def _round_up(x, m):
    return ((x + m - 1) // m) * m


def _tile_nk(d_in, d_out, tn=None, tk=None):
    """Deterministic N/K tile choice shared by prepare_params and the forward."""
    if tk is None:
        tk = min(1024, _round_up(d_in, 128))
    if tn is None:
        tn = min(1024, _round_up(d_out, 128))
    return tn, tk


def _linear_kernel(x_ref, w_ref, b_ref, o_ref, acc_ref):
    # x_ref: (tm, tk) bf16   w_ref: (tk, tn) bf16   b_ref: (1, tn) f32
    # o_ref: (tm, tn) out dtype   acc_ref: (tm, tn) f32, resident across the K axis.
    k = pl.program_id(2)
    prod = jnp.dot(x_ref[...], w_ref[...], preferred_element_type=jnp.float32)

    @pl.when(k == 0)
    def _():
        acc_ref[...] = prod          # write-on-first-step: no zero-init + reload

    @pl.when(k > 0)
    def _():
        acc_ref[...] += prod

    @pl.when(k == pl.num_programs(2) - 1)
    def _():
        o_ref[...] = (acc_ref[...] + b_ref[...]).astype(o_ref.dtype)


def prepare_params(weight_t, bias, *, tn=None, tk=None):
    """Pad to tile multiples and cast once at init, so the per-step forward does no
    HBM repack of the (large) weight. weight_t is the transposed Linear weight
    (d_in, d_out); returns (bf16 padded weight, f32 padded bias)."""
    d_in, d_out = weight_t.shape
    tn, tk = _tile_nk(d_in, d_out, tn, tk)
    kp, np_ = _round_up(d_in, tk), _round_up(d_out, tn)
    w = weight_t
    if (kp, np_) != (d_in, d_out):
        w = jnp.pad(w, ((0, kp - d_in), (0, np_ - d_out)))
    b = bias.astype(jnp.float32)
    if np_ != d_out:
        b = jnp.pad(b, (0, np_ - d_out))
    return w.astype(jnp.bfloat16), b


@functools.partial(jax.jit, static_argnames=("out_features", "tm", "tn", "tk"))
def magm_head_l1_forward(x, weight_t, bias, *, out_features=None, tm=None, tn=None, tk=None):
    """Forward of MAGMHead_L1.prediction_head (nn.Linear).

    x        : (B, S, D_in)
    weight_t : (D_in, D_out) unpadded, or pre-padded/bf16 from prepare_params()
    bias     : (D_out,) or pre-padded f32 from prepare_params()
    out_features : true D_out (required iff weight_t/bias are pre-padded)
    returns  : (B, S, D_out) in x.dtype
    """
    B, S, D_in = x.shape
    M = B * S
    d_out = out_features if out_features is not None else weight_t.shape[1]

    # --- tile selection -------------------------------------------------------
    sub = 16  # bf16 sublane granularity (kernel matmul operands are bf16)
    tn, tk = _tile_nk(D_in, d_out, tn, tk)
    tm_auto = tm is None
    if tm_auto:
        tm = min(512, _round_up(M, sub))

    Kp = _round_up(D_in, tk)
    Np = _round_up(d_out, tn)
    Mp = _round_up(M, tm)

    # v7x megacore: make sure both TensorCores get parallel work when possible.
    if tm_auto and (Mp // tm) * (Np // tn) == 1 and Mp >= 2 * sub:
        tm = _round_up((Mp + 1) // 2, sub)
        Mp = _round_up(M, tm)

    # --- operand prep (bf16 MXU inputs, f32 bias) -----------------------------
    x2d = x.reshape(M, D_in)
    if (Mp, Kp) != (M, D_in):
        x2d = jnp.pad(x2d, ((0, Mp - M), (0, Kp - D_in)))
    x2d = x2d.astype(jnp.bfloat16)

    w2d = weight_t
    if w2d.shape != (Kp, Np):
        # Unpadded-param path; prefer prepare_params() to hoist this out of the step.
        w2d = jnp.pad(w2d, ((0, Kp - w2d.shape[0]), (0, Np - w2d.shape[1])))
    w2d = w2d.astype(jnp.bfloat16)

    b2d = bias.reshape(1, -1).astype(jnp.float32)
    if b2d.shape[1] != Np:
        b2d = jnp.pad(b2d, ((0, 0), (0, Np - b2d.shape[1])))

    grid = (Mp // tm, Np // tn, Kp // tk)

    cost = pl.CostEstimate(
        flops=2 * Mp * Kp * Np,
        transcendentals=0,
        bytes_accessed=(Mp * Kp * 2 + Kp * Np * 2 + Np * 4 + Mp * Np * x.dtype.itemsize),
    )

    out2d = pl.pallas_call(
        _linear_kernel,
        out_shape=jax.ShapeDtypeStruct((Mp, Np), x.dtype),
        grid=grid,
        in_specs=[
            pl.BlockSpec((tm, tk), lambda i, j, k: (i, k)),   # x tile (bf16)
            pl.BlockSpec((tk, tn), lambda i, j, k: (k, j)),   # W_t tile (bf16)
            pl.BlockSpec((1, tn), lambda i, j, k: (0, j)),    # bias tile (f32)
        ],
        out_specs=pl.BlockSpec((tm, tn), lambda i, j, k: (i, j)),
        scratch_shapes=[pltpu.VMEM((tm, tn), jnp.float32)],
        compiler_params=pltpu.CompilerParams(
            # M and N are independent -> parallel (2 TCs on v7x); K is the reduction
            # with an output-resident accumulator -> arbitrary, last.
            dimension_semantics=("parallel", "parallel", "arbitrary"),
            vmem_limit_bytes=48 * 1024 * 1024,   # fits v7x's 64 MiB/core with headroom
        ),
        cost_estimate=cost,
    )(x2d, w2d, b2d)

    out2d = out2d[:M, :d_out]
    return out2d.reshape(B, S, d_out)


def init_params(key, input_size, output_size):
    # Matches MAGMHead_L1._init_weights: weight ~ N(0, 0.02), bias = 0.
    w = 0.02 * jax.random.normal(key, (output_size, input_size), dtype=jnp.float32)
    b = jnp.zeros((output_size,), dtype=jnp.float32)
    # store transposed (D_in, D_out) so the kernel does x @ W^T directly
    return w.T, b


# TODO(synk): loss_fn (L1 loss) and anneal_weights are training-time scalar bookkeeping,
# not part of the module forward; they are intentionally not implemented as kernels.


if __name__ == "__main__":
    key = jax.random.PRNGKey(0)
    k_x, k_w = jax.random.split(key)

    B, S = 2, 8
    input_size, output_size = 32, 64

    x = jax.random.normal(k_x, (B, S, input_size), dtype=jnp.float32)
    weight_t_raw, bias_raw = init_params(k_w, input_size, output_size)

    # Hoist padding + bf16 cast out of the per-call path (done once at init).
    weight_t, bias = prepare_params(weight_t_raw, bias_raw)

    out = magm_head_l1_forward(x, weight_t, bias, out_features=output_size)
    out = jax.block_until_ready(out)

    # reference check against plain JAX (f32); tolerance covers bf16 input rounding
    ref = x @ weight_t_raw + bias_raw
    assert out.shape == (B, S, output_size)
    assert jnp.allclose(out, ref, atol=1e-2, rtol=1e-2), float(jnp.max(jnp.abs(out - ref)))

    print("KERNEL_OK")
</pallas_src>

<mosaic_0001>
module attributes {stable_mosaic.version = 11 : i64} {
  func.func @_linear_kernel(%arg0: i32, %arg1: i32, %arg2: i32, %arg3: memref<16x128xbf16, #tpu.memory_space<vmem>>, %arg4: memref<128x128xbf16, #tpu.memory_space<vmem>>, %arg5: memref<1x128xf32, #tpu.memory_space<vmem>>, %arg6: memref<16x128xf32, #tpu.memory_space<vmem>>, %arg7: memref<16x128xf32, #tpu.memory_space<vmem>>) attributes {dimension_semantics = [#tpu.dimension_semantics<parallel>, #tpu.dimension_semantics<parallel>, #tpu.dimension_semantics<arbitrary>], iteration_bounds = array<i64: 1, 1, 1>, scalar_prefetch = 0 : i64, scratch_operands = 1 : i64, tpu.core_type = #tpu.core_type<tc>, window_params = [{transform_indices = @transform_0, window_bounds = array<i64: 16, 128>}, {transform_indices = @transform_1, window_bounds = array<i64: 128, 128>}, {transform_indices = @transform_2, window_bounds = array<i64: 1, 128>}, {transform_indices = @transform_3, window_bounds = array<i64: 16, 128>}]} {
    %c0 = arith.constant 0 : index
    %c0_0 = arith.constant 0 : index
    %0 = vector.load %arg3[%c0, %c0_0] : memref<16x128xbf16, #tpu.memory_space<vmem>>, vector<16x128xbf16>
    %c0_1 = arith.constant 0 : index
    %c0_2 = arith.constant 0 : index
    %1 = vector.load %arg4[%c0_1, %c0_2] : memref<128x128xbf16, #tpu.memory_space<vmem>>, vector<128x128xbf16>
    %cst = arith.constant dense<0.000000e+00> : vector<16x128xf32>
    %2 = tpu.matmul %0, %1, %cst {dimension_numbers = #tpu.dot_dimension_numbers<[1], [0], [0], [1], [0, 0, 1, 1], [], []>} : vector<16x128xbf16>, vector<128x128xbf16>, vector<16x128xf32> -> vector<16x128xf32>
    %c0_i32 = arith.constant 0 : i32
    %3 = arith.cmpi eq, %arg2, %c0_i32 : i32
    %4 = arith.extui %3 : i1 to i32
    %c0_i32_3 = arith.constant 0 : i32
    %5 = arith.cmpi ne, %4, %c0_i32_3 : i32
    scf.if %5 {
      %c0_8 = arith.constant 0 : index
      %c0_9 = arith.constant 0 : index
      %12 = vector.load %arg7[%c0_8, %c0_9] : memref<16x128xf32, #tpu.memory_space<vmem>>, vector<16x128xf32>
      tpu.vector_store %arg7[%c0_8, %c0_9], %2 {strides = array<i32>} : memref<16x128xf32, #tpu.memory_space<vmem>>, vector<16x128xf32>,
    } else {
    }
    %c0_i32_4 = arith.constant 0 : i32
    %6 = arith.cmpi sgt, %arg2, %c0_i32_4 : i32
    %7 = arith.extui %6 : i1 to i32
    %c0_i32_5 = arith.constant 0 : i32
    %8 = arith.cmpi ne, %7, %c0_i32_5 : i32
    scf.if %8 {
      %c0_8 = arith.constant 0 : index
      %c0_9 = arith.constant 0 : index
      %12 = vector.load %arg7[%c0_8, %c0_9] : memref<16x128xf32, #tpu.memory_space<vmem>>, vector<16x128xf32>
      %13 = arith.addf %12, %2 : vector<16x128xf32>
      %c0_10 = arith.constant 0 : index
      %c0_11 = arith.constant 0 : index
      %14 = vector.load %arg7[%c0_10, %c0_11] : memref<16x128xf32, #tpu.memory_space<vmem>>, vector<16x128xf32>
      tpu.vector_store %arg7[%c0_10, %c0_11], %13 {strides = array<i32>} : memref<16x128xf32, #tpu.memory_space<vmem>>, vector<16x128xf32>,
    } else {
    }
    %c0_i32_6 = arith.constant 0 : i32
    %9 = arith.cmpi eq, %arg2, %c0_i32_6 : i32
    %10 = arith.extui %9 : i1 to i32
    %c0_i32_7 = arith.constant 0 : i32
    %11 = arith.cmpi ne, %10, %c0_i32_7 : i32
    scf.if %11 {
      %c0_8 = arith.constant 0 : index
      %c0_9 = arith.constant 0 : index
      %12 = vector.load %arg7[%c0_8, %c0_9] : memref<16x128xf32, #tpu.memory_space<vmem>>, vector<16x128xf32>
      %c0_10 = arith.constant 0 : index
      %c0_11 = arith.constant 0 : index
      %13 = vector.load %arg5[%c0_10, %c0_11] : memref<1x128xf32, #tpu.memory_space<vmem>>, vector<1x128xf32>
      %14 = vector.broadcast %13 : vector<1x128xf32> to vector<16x128xf32>
      %15 = arith.addf %12, %14 : vector<16x128xf32>
      %c0_12 = arith.constant 0 : index
      %c0_13 = arith.constant 0 : index
      %16 = vector.load %arg6[%c0_12, %c0_13] : memref<16x128xf32, #tpu.memory_space<vmem>>, vector<16x128xf32>
      tpu.vector_store %arg6[%c0_12, %c0_13], %15 {strides = array<i32>} : memref<16x128xf32, #tpu.memory_space<vmem>>, vector<16x128xf32>,
    } else {
    }
    return
  }
  func.func @transform_0(%arg0: i32, %arg1: i32, %arg2: i32) -> (i32, i32) {
    %c0_i32 = arith.constant 0 : i32
    return %arg0, %arg2 : i32, i32
  }
  func.func @transform_1(%arg0: i32, %arg1: i32, %arg2: i32) -> (i32, i32) {
    %c0_i32 = arith.constant 0 : i32
    return %arg2, %arg1 : i32, i32
  }
  func.func @transform_2(%arg0: i32, %arg1: i32, %arg2: i32) -> (i32, i32) {
    %c0_i32 = arith.constant 0 : i32
    %c0_i32_0 = arith.constant 0 : i32
    return %c0_i32, %arg1 : i32, i32
  }
  func.func @transform_3(%arg0: i32, %arg1: i32, %arg2: i32) -> (i32, i32) {
    %c0_i32 = arith.constant 0 : i32
    return %arg0, %arg1 : i32, i32
  }
}

</mosaic_0001>

<bundles_post_ra>
// kernel: magm_head_l1_forward.1
= control target key start
LH: loop header
LB: loop body
LE: loop exit
PB: predicated region body
PF: predicated region fallthrough
CT: control target
= control target key end

     0   :  { %8 = vsyncpa [#allocation4], 0  ;;  %s256_s12 = smov [#allocation3]   ;;  %s305_s0 = inlined_call_operand.vmem [shape: bf16[16,128], index: 0, kind: input, shape index: {}]   ;;  %s306_s1 = inlined_call_operand.hbm [shape: bf16[128,128], index: 1, kind: input, shape index: {}]   ;;  %s307_s2 = inlined_call_operand.vmem [shape: f32[1,128], index: 2, kind: input, shape index: {}]   ;;  %s308_s3 = inlined_call_operand.vmem [shape: f32[16,128], index: 3, kind: output, shape index: {}]  }
   0x1   :  { %s16_s13 = sshll.u32 %s256_s12, 4  ;;  %s232_s16 = scalar_lea.hbm %s306_s1, 1024  ;;  %s17_s13 = int_to_ptr.vmem [resolvable:$true] %s16_s13 }
   0x2   :  { %p233_p0 = scmp.ne.s32.totalorder %s306_s1, %s232_s16  ;;  %p236_p1 = scmp.lt.u32.totalorder %s232_s16, %s306_s1 }
   0x4   :  { %p238_p2 = pnand %p236_p1, %p233_p0 }
   0x6   :  { %241 = shalt.err (!%p238_p2)
}
   0x7   :  { %s242_s21 = scalar_lea.vmem %s17_s13, 1024  ;;  %p247_p4 = scmp.lt.s32.totalorder %s17_s13, %s17_s13 }
   0x8   :  { %p243_p3 = scmp.ne.s32.totalorder %s17_s13, %s242_s21  ;;  %p248_p5 = scmp.lt.s32.totalorder %s242_s21, %s242_s21 }
   0xa   :  { %p249_p6 = por %p248_p5, %p247_p4 }
   0xc   :  { %p250_p7 = pnand %p249_p6, %p243_p3 }
   0xe   :  { %253 = shalt.err (!%p250_p7)
}
   0xf   :  { %s257_s22 = smov 64   ;;  %s258_s23 = smov 4  }
  0x10   :  { %22 = dma.hbm_to_vmem [thread:$0]  %s306_s1, 1024, %s17_s13, [#allocation4], %s257_s22, %s257_s22, %s258_s23  }
  0x11   :  { %254 = dma.done.wait [#allocation4], 1024  }
  0x12   :  { %255 = vsyncadd [#allocation4], 4294966272  ;;  %v259_v0 = vmov 0.0   ;;  %vm260_vm0 = vmmov 0   ;;  %v223_v1 = vld [vmem:[#allocation3] sm:$0xff]   ;;  %v224_v2 = vld [vmem:[#allocation3 + $0x8] sm:$0xff]  }
  0x13   :  { %198 = vmatprep.subr.bf16.mxu0 %v259_v0  ;;  %214 = vmatprep.mubr.msk.bf16.mxu0 %vm260_vm0, %v259_v0  ;;  %v225_v3 = vld [vmem:[#allocation3 + $0x10] sm:$0xff]   ;;  %v226_v4 = vld [vmem:[#allocation3 + $0x18] sm:$0xff]   ;;  %v227_v5 = vld [vmem:[#allocation3 + $0x20] sm:$0xff]  }
  0x14   :  { %199 = vmatpush3.bf16.msra.mxu0 %v223_v1  ;;  %v228_v6 = vld [vmem:[#allocation3 + $0x28] sm:$0xff]   ;;  %v229_v7 = vld [vmem:[#allocation3 + $0x30] sm:$0xff]   ;;  %v230_v8 = vld [vmem:[#allocation3 + $0x38] sm:$0xff]  }
  0x15   :  { %200 = vmatprep.subr.bf16.mxu0 %v259_v0  ;;  %v231_v9 = vld [vmem:[%s305_s0] sm:$0xff]  }
  0x16   :  { %v188_v10 = vld [vmem:[%s307_s2] ss:$0 sm:$0xff] }
  0x18   :  { %201 = vmatpush3.bf16.msra.mxu0 %v224_v2 }
  0x19   :  { %202 = vmatprep.subr.bf16.mxu0 %v259_v0 }
  0x1c   :  { %203 = vmatpush3.bf16.msra.mxu0 %v225_v3 }
  0x1d   :  { %204 = vmatprep.subr.bf16.mxu0 %v259_v0 }
  0x20   :  { %205 = vmatpush3.bf16.msra.mxu0 %v226_v4 }
  0x21   :  { %206 = vmatprep.subr.bf16.mxu0 %v259_v0 }
  0x24   :  { %207 = vmatpush3.bf16.msra.mxu0 %v227_v5 }
  0x25   :  { %208 = vmatprep.subr.bf16.mxu0 %v259_v0 }
  0x28   :  { %209 = vmatpush3.bf16.msra.mxu0 %v228_v6 }
  0x29   :  { %210 = vmatprep.subr.bf16.mxu0 %v259_v0 }
  0x2c   :  { %211 = vmatpush3.bf16.msra.mxu0 %v229_v7 }
  0x2d   :  { %212 = vmatprep.subr.bf16.mxu0 %v259_v0 }
  0x30   :  { %213 = vmatpush3.bf16.msra.mxu0 %v230_v8 }
  0x33   :  { %215 = vmatmul.mubr.bf16.vlgmr.msra.gmra.mrb[0].mxu0 %v231_v9 }
 0x106   :  { %v135_v11 = vpop.f32.mrb[0].mxu0 }
 0x107   :  { %v170_v12 = vadd.f32 %v188_v10, %v135_v11  ;;  %v216_v13 = vpop.f32.mrb[1].mxu0 }
 0x108   :  { %v138_v14 = vpop.f32.mrb[2].mxu0 }
 0x109   :  { %172 = vst [vmem:[%s308_s3] sm:$0xff] %v170_v12  ;;  %v171_v15 = vadd.f32 %v188_v10, %v138_v14  ;;  %v217_v16 = vpop.f32.mrb[3].mxu0 }
 0x10b   :  { %173 = vst [vmem:[%s308_s3 + $0x8] sm:$0xff] %v171_v15 }
 0x10c   :  { %178 = vsyncpa [#allocation4], 1 }

</bundles_post_ra>
